<compile_context>
chip_gen: v6e
topology: v6e:2x2x1
jax: 0.10.0
libtpu: 0.0.40
codegen_flags: <defaults>
</compile_context>

<pallas_src>
import functools
import math

import jax
import jax.numpy as jnp
from jax import lax
from jax.experimental import pallas as pl
from jax.experimental.pallas import tpu as pltpu

_LANE = 128


def _round_up(n, m):
    return ((n + m - 1) // m) * m


def _choose_block_rows(rows, target_rows=512):
    """Pick rows-of-128-samples per grid step.

    - multiple of 32 (so the inner chunk size can be 32 rows = 4 vregs/slab)
    - >= 2 grid steps for moderate/large inputs (v7x megacore)
    - capped at `target_rows` (512 rows = 65536 samples ~= 0.75 MiB/step dbl-buffered)
    """
    if rows <= 16:
        return _round_up(rows, 8)
    half = _round_up((rows + 1) // 2, 32)
    return min(_round_up(target_rows, 32), half)


def _gmm_kernel(means_ref, coef_ref, const_ref, x_ref, out_ref, *, K, D, R_C):
    # means_ref: SMEM (K*D,)           f32  component means, flattened
    # coef_ref : SMEM (K*D*(D+1)//2,)  f32  -0.5 * Sigma^{-1}, upper-tri packed,
    #                                        off-diagonal entries pre-doubled
    # const_ref: SMEM (K,)             f32  log_softmax(pi)[k]
    #                                        - 0.5*(D*log(2pi) + logdet Sigma_k)
    # x_ref    : VMEM (D, R, 128)      f32  samples; lane = sample, sublane = row
    # out_ref  : VMEM (R, 128)         f32  logsumexp_k of weighted log-probs
    T = D * (D + 1) // 2
    R = out_ref.shape[0]
    n_chunks = R // R_C

    # Hoist the tiny SMEM parameter reads out of the (unrolled) chunk loop.
    mu = [means_ref[t] for t in range(K * D)]
    cf = [coef_ref[t] for t in range(K * T)]
    ct = [const_ref[k] for k in range(K)]

    def chunk(c, carry):
        r0 = pl.multiple_of(c * R_C, R_C)                    # sublane-aligned start
        # Per-feature sample slabs: full (R_C, 128) vreg-packed tiles.
        # (.astype is a no-op for f32 input; keeps a bf16-input path open for v5e.)
        x = [x_ref[i, pl.ds(r0, R_C), :].astype(jnp.float32) for i in range(D)]

        # Per-component log-density with -0.5 / symmetry folded into `cf`.
        lls = []
        for k in range(K):
            d = [x[i] - mu[k * D + i] for i in range(D)]
            q = None
            idx = 0
            for i in range(D):
                for j in range(i, D):
                    term = cf[k * T + idx] * (d[i] * d[j])
                    q = term if q is None else q + term
                    idx += 1
            lls.append(q + ct[k])

        # Batch logsumexp over K (K exps + 1 log; no online rescales).
        m = lls[0]
        for k in range(1, K):
            m = jnp.maximum(m, lls[k])
        s = jnp.exp(lls[0] - m)
        for k in range(1, K):
            s = s + jnp.exp(lls[k] - m)

        out_ref[pl.ds(r0, R_C), :] = m + jnp.log(s)
        return carry

    lax.fori_loop(0, n_chunks, chunk, 0, unroll=True)


def gmm_log_likelihood(x, pi, means, chol_var, *, block_rows=None):
    """Pallas implementation of GMM.forward: returns log p(x_n), shape (N,)."""
    N, D = x.shape
    K = pi.shape[0]
    T = D * (D + 1) // 2

    # --- tiny per-component parameter prep (plain JAX glue, O(K*D^3)) ---------
    L = jnp.tril(chol_var).astype(jnp.float32)                          # (K, D, D)
    sigma = L @ jnp.swapaxes(L, -1, -2) + 1e-6 * jnp.eye(D, dtype=jnp.float32)
    prec = jnp.linalg.inv(sigma)                                        # (K, D, D)
    _, logdet = jnp.linalg.slogdet(sigma)                               # (K,)
    log_w = jax.nn.log_softmax(pi.astype(jnp.float32))                  # (K,)
    const = (log_w - 0.5 * (D * math.log(2.0 * math.pi) + logdet)).astype(jnp.float32)

    # Fold -0.5 and symmetry: upper-triangle packed, off-diagonals doubled.
    A = -0.5 * prec
    cols = []
    for i in range(D):
        for j in range(i, D):
            scale = 1.0 if i == j else 2.0
            cols.append(scale * A[:, i, j])
    coef = jnp.stack(cols, axis=1).reshape(K * T).astype(jnp.float32)   # (K*T,)
    means_flat = means.astype(jnp.float32).reshape(K * D)               # (K*D,)

    # --- sample layout: (N, D) -> (D, rows_pad, 128), lane = sample -----------
    rows = max(1, -(-N // _LANE))
    if block_rows is None:
        R = _choose_block_rows(rows)
    else:
        R = max(8, _round_up(int(block_rows), 8))
    rows_pad = _round_up(rows, R)
    n_pad = rows_pad * _LANE
    R_C = math.gcd(R, 32)            # inner chunk: 8/16/32 rows (1/2/4 vregs per slab)

    # TODO(synk): this pad+transpose is an extra HBM pass (~8 B/sample); store x
    # feature-major upstream (or bf16 on v5e) to remove it.
    x_pad = jnp.pad(x.astype(jnp.float32), ((0, n_pad - N), (0, 0)))    # zeros -> finite lls
    x_t = jnp.transpose(x_pad.reshape(rows_pad, _LANE, D), (2, 0, 1))   # (D, rows_pad, 128)

    kernel = functools.partial(_gmm_kernel, K=int(K), D=int(D), R_C=int(R_C))

    out = pl.pallas_call(
        kernel,
        out_shape=jax.ShapeDtypeStruct((rows_pad, _LANE), jnp.float32),
        grid_spec=pltpu.PrefetchScalarGridSpec(
            num_scalar_prefetch=0,
            grid=(rows_pad // R,),
            in_specs=[
                pl.BlockSpec(memory_space=pltpu.MemorySpace.SMEM),      # means (K*D,)
                pl.BlockSpec(memory_space=pltpu.MemorySpace.SMEM),      # coef  (K*T,)
                pl.BlockSpec(memory_space=pltpu.MemorySpace.SMEM),      # const (K,)
                pl.BlockSpec((D, R, _LANE), lambda i: (0, i, 0)),       # x tile (VMEM)
            ],
            out_specs=pl.BlockSpec((R, _LANE), lambda i: (i, 0)),       # lane-dense out
        ),
        compiler_params=pltpu.CompilerParams(
            dimension_semantics=("parallel",)),
    )(means_flat, coef, const, x_t)
    return out.reshape(n_pad)[:N]


def gmm_reference(x, pi, means, chol_var):
    """Pure-JAX reference mirroring the PyTorch forward."""
    D = x.shape[-1]
    L = jnp.tril(chol_var)
    sigma = L @ jnp.swapaxes(L, -1, -2) + 1e-6 * jnp.eye(D, dtype=x.dtype)
    prec = jnp.linalg.inv(sigma)
    _, logdet = jnp.linalg.slogdet(sigma)
    diff = x[:, None, :] - means[None, :, :]                            # (N, K, D)
    q = jnp.einsum('nkd,kde,nke->nk', diff, prec, diff)
    log_probs = -0.5 * (D * math.log(2.0 * math.pi) + logdet[None, :] + q)
    weighted = log_probs + jax.nn.log_softmax(pi)[None, :]
    return jax.scipy.special.logsumexp(weighted, axis=1)


if __name__ == "__main__":
    K, D = 3, 2

    # Deterministic parameters (shapes per GMM.__init__):
    #   pi = ones(K)/K, means = means_init, chol_var = lower-triangular (K, D, D)
    means_init = jnp.array([[-2.0, 0.0], [0.0, 2.0], [2.0, -1.0]], dtype=jnp.float32)
    pi = jnp.ones((K,), dtype=jnp.float32) / K
    chol_var = jnp.stack(
        [jnp.eye(D, dtype=jnp.float32) * (1.0 + 0.25 * k)
         + 0.1 * k * jnp.tri(D, k=-1, dtype=jnp.float32)
         for k in range(K)],
        axis=0,
    )  # (K, D, D)

    key = jax.random.PRNGKey(0)
    k1, k2 = jax.random.split(key)

    # 1) small N, not a multiple of 128 -> exercises padding + final slice
    x_small = jax.random.normal(k1, (200, D), dtype=jnp.float32)
    out = jax.block_until_ready(gmm_log_likelihood(x_small, pi, means_init, chol_var))
    ref = gmm_reference(x_small, pi, means_init, chol_var)
    assert out.shape == (200,)
    assert jnp.allclose(out, ref, atol=1e-4, rtol=1e-4)

    # 2) larger N -> multi-step grid (>=2 steps) + multi-chunk inner loop
    x_big = 2.0 * jax.random.normal(k2, (70000, D), dtype=jnp.float32)
    out2 = jax.block_until_ready(gmm_log_likelihood(x_big, pi, means_init, chol_var))
    ref2 = gmm_reference(x_big, pi, means_init, chol_var)
    assert out2.shape == (70000,)
    assert jnp.allclose(out2, ref2, atol=1e-4, rtol=1e-4)

    # 3) force many small grid steps to validate the tiled index_map path
    out3 = jax.block_until_ready(
        gmm_log_likelihood(x_big, pi, means_init, chol_var, block_rows=32))
    assert jnp.allclose(out3, ref2, atol=1e-4, rtol=1e-4)

    print("KERNEL_OK")
</pallas_src>

<mosaic_0001>
module attributes {stable_mosaic.version = 11 : i64} {
  func.func @_gmm_kernel(%arg0: i32, %arg1: memref<6xf32, #tpu.memory_space<smem>>, %arg2: memref<9xf32, #tpu.memory_space<smem>>, %arg3: memref<3xf32, #tpu.memory_space<smem>>, %arg4: memref<2x8x128xf32, #tpu.memory_space<vmem>>, %arg5: memref<8x128xf32, #tpu.memory_space<vmem>>) attributes {dimension_semantics = [#tpu.dimension_semantics<parallel>], iteration_bounds = array<i64: 1>, scalar_prefetch = 0 : i64, scratch_operands = 0 : i64, tpu.core_type = #tpu.core_type<tc>, window_params = [{transform_indices = @transform_0, window_bounds = array<i64: 6>}, {transform_indices = @transform_1, window_bounds = array<i64: 9>}, {transform_indices = @transform_2, window_bounds = array<i64: 3>}, {transform_indices = @transform_3, window_bounds = array<i64: 2, 8, 128>}, {transform_indices = @transform_4, window_bounds = array<i64: 8, 128>}]} {
    %c0 = arith.constant 0 : index
    %0 = memref.load %arg1[%c0] : memref<6xf32, #tpu.memory_space<smem>>
    %c1 = arith.constant 1 : index
    %1 = memref.load %arg1[%c1] : memref<6xf32, #tpu.memory_space<smem>>
    %c2 = arith.constant 2 : index
    %2 = memref.load %arg1[%c2] : memref<6xf32, #tpu.memory_space<smem>>
    %c3 = arith.constant 3 : index
    %3 = memref.load %arg1[%c3] : memref<6xf32, #tpu.memory_space<smem>>
    %c4 = arith.constant 4 : index
    %4 = memref.load %arg1[%c4] : memref<6xf32, #tpu.memory_space<smem>>
    %c5 = arith.constant 5 : index
    %5 = memref.load %arg1[%c5] : memref<6xf32, #tpu.memory_space<smem>>
    %c0_0 = arith.constant 0 : index
    %6 = memref.load %arg2[%c0_0] : memref<9xf32, #tpu.memory_space<smem>>
    %c1_1 = arith.constant 1 : index
    %7 = memref.load %arg2[%c1_1] : memref<9xf32, #tpu.memory_space<smem>>
    %c2_2 = arith.constant 2 : index
    %8 = memref.load %arg2[%c2_2] : memref<9xf32, #tpu.memory_space<smem>>
    %c3_3 = arith.constant 3 : index
    %9 = memref.load %arg2[%c3_3] : memref<9xf32, #tpu.memory_space<smem>>
    %c4_4 = arith.constant 4 : index
    %10 = memref.load %arg2[%c4_4] : memref<9xf32, #tpu.memory_space<smem>>
    %c5_5 = arith.constant 5 : index
    %11 = memref.load %arg2[%c5_5] : memref<9xf32, #tpu.memory_space<smem>>
    %c6 = arith.constant 6 : index
    %12 = memref.load %arg2[%c6] : memref<9xf32, #tpu.memory_space<smem>>
    %c7 = arith.constant 7 : index
    %13 = memref.load %arg2[%c7] : memref<9xf32, #tpu.memory_space<smem>>
    %c8 = arith.constant 8 : index
    %14 = memref.load %arg2[%c8] : memref<9xf32, #tpu.memory_space<smem>>
    %c0_6 = arith.constant 0 : index
    %15 = memref.load %arg3[%c0_6] : memref<3xf32, #tpu.memory_space<smem>>
    %c1_7 = arith.constant 1 : index
    %16 = memref.load %arg3[%c1_7] : memref<3xf32, #tpu.memory_space<smem>>
    %c2_8 = arith.constant 2 : index
    %17 = memref.load %arg3[%c2_8] : memref<3xf32, #tpu.memory_space<smem>>
    %c0_i32 = arith.constant 0 : i32
    %c8_i32 = arith.constant 8 : i32
    %18 = arith.muli %c0_i32, %c8_i32 : i32
    %19 = tpu.assume_multiple %18, 8 : i32
    %c0_9 = arith.constant 0 : index
    %20 = arith.index_cast %19 : i32 to index
    %c0_10 = arith.constant 0 : index
    %21 = vector.load %arg4[%c0_9, %20, %c0_10] : memref<2x8x128xf32, #tpu.memory_space<vmem>>, vector<1x8x128xf32>
    %22 = vector.shape_cast %21 : vector<1x8x128xf32> to vector<8x128xf32>
    %c1_11 = arith.constant 1 : index
    %23 = arith.index_cast %19 : i32 to index
    %c0_12 = arith.constant 0 : index
    %24 = vector.load %arg4[%c1_11, %23, %c0_12] : memref<2x8x128xf32, #tpu.memory_space<vmem>>, vector<1x8x128xf32>
    %25 = vector.shape_cast %24 : vector<1x8x128xf32> to vector<8x128xf32>
    %26 = vector.broadcast %0 : f32 to vector<8x128xf32>
    %27 = arith.subf %22, %26 : vector<8x128xf32>
    %28 = vector.broadcast %1 : f32 to vector<8x128xf32>
    %29 = arith.subf %25, %28 : vector<8x128xf32>
    %30 = arith.mulf %27, %27 : vector<8x128xf32>
    %31 = vector.broadcast %6 : f32 to vector<8x128xf32>
    %32 = arith.mulf %31, %30 : vector<8x128xf32>
    %33 = arith.mulf %27, %29 : vector<8x128xf32>
    %34 = vector.broadcast %7 : f32 to vector<8x128xf32>
    %35 = arith.mulf %34, %33 : vector<8x128xf32>
    %36 = arith.addf %32, %35 : vector<8x128xf32>
    %37 = arith.mulf %29, %29 : vector<8x128xf32>
    %38 = vector.broadcast %8 : f32 to vector<8x128xf32>
    %39 = arith.mulf %38, %37 : vector<8x128xf32>
    %40 = arith.addf %36, %39 : vector<8x128xf32>
    %41 = vector.broadcast %15 : f32 to vector<8x128xf32>
    %42 = arith.addf %40, %41 : vector<8x128xf32>
    %43 = vector.broadcast %2 : f32 to vector<8x128xf32>
    %44 = arith.subf %22, %43 : vector<8x128xf32>
    %45 = vector.broadcast %3 : f32 to vector<8x128xf32>
    %46 = arith.subf %25, %45 : vector<8x128xf32>
    %47 = arith.mulf %44, %44 : vector<8x128xf32>
    %48 = vector.broadcast %9 : f32 to vector<8x128xf32>
    %49 = arith.mulf %48, %47 : vector<8x128xf32>
    %50 = arith.mulf %44, %46 : vector<8x128xf32>
    %51 = vector.broadcast %10 : f32 to vector<8x128xf32>
    %52 = arith.mulf %51, %50 : vector<8x128xf32>
    %53 = arith.addf %49, %52 : vector<8x128xf32>
    %54 = arith.mulf %46, %46 : vector<8x128xf32>
    %55 = vector.broadcast %11 : f32 to vector<8x128xf32>
    %56 = arith.mulf %55, %54 : vector<8x128xf32>
    %57 = arith.addf %53, %56 : vector<8x128xf32>
    %58 = vector.broadcast %16 : f32 to vector<8x128xf32>
    %59 = arith.addf %57, %58 : vector<8x128xf32>
    %60 = vector.broadcast %4 : f32 to vector<8x128xf32>
    %61 = arith.subf %22, %60 : vector<8x128xf32>
    %62 = vector.broadcast %5 : f32 to vector<8x128xf32>
    %63 = arith.subf %25, %62 : vector<8x128xf32>
    %64 = arith.mulf %61, %61 : vector<8x128xf32>
    %65 = vector.broadcast %12 : f32 to vector<8x128xf32>
    %66 = arith.mulf %65, %64 : vector<8x128xf32>
    %67 = arith.mulf %61, %63 : vector<8x128xf32>
    %68 = vector.broadcast %13 : f32 to vector<8x128xf32>
    %69 = arith.mulf %68, %67 : vector<8x128xf32>
    %70 = arith.addf %66, %69 : vector<8x128xf32>
    %71 = arith.mulf %63, %63 : vector<8x128xf32>
    %72 = vector.broadcast %14 : f32 to vector<8x128xf32>
    %73 = arith.mulf %72, %71 : vector<8x128xf32>
    %74 = arith.addf %70, %73 : vector<8x128xf32>
    %75 = vector.broadcast %17 : f32 to vector<8x128xf32>
    %76 = arith.addf %74, %75 : vector<8x128xf32>
    %77 = arith.maximumf %42, %59 : vector<8x128xf32>
    %78 = arith.maximumf %77, %76 : vector<8x128xf32>
    %79 = arith.subf %42, %78 : vector<8x128xf32>
    %80 = math.exp %79 : vector<8x128xf32>
    %81 = arith.subf %59, %78 : vector<8x128xf32>
    %82 = math.exp %81 : vector<8x128xf32>
    %83 = arith.addf %80, %82 : vector<8x128xf32>
    %84 = arith.subf %76, %78 : vector<8x128xf32>
    %85 = math.exp %84 : vector<8x128xf32>
    %86 = arith.addf %83, %85 : vector<8x128xf32>
    %87 = math.log %86 : vector<8x128xf32>
    %88 = arith.addf %78, %87 : vector<8x128xf32>
    %89 = arith.index_cast %19 : i32 to index
    %c0_13 = arith.constant 0 : index
    %90 = vector.load %arg5[%89, %c0_13] : memref<8x128xf32, #tpu.memory_space<vmem>>, vector<8x128xf32>
    tpu.vector_store %arg5[%89, %c0_13], %88 {strides = array<i32>} : memref<8x128xf32, #tpu.memory_space<vmem>>, vector<8x128xf32>,
    %c1_i32 = arith.constant 1 : i32
    return
  }
  func.func @transform_0(%arg0: i32) -> i32 {
    %c0_i32 = arith.constant 0 : i32
    %c0_i32_0 = arith.constant 0 : i32
    return %c0_i32 : i32
  }
  func.func @transform_1(%arg0: i32) -> i32 {
    %c0_i32 = arith.constant 0 : i32
    %c0_i32_0 = arith.constant 0 : i32
    return %c0_i32 : i32
  }
  func.func @transform_2(%arg0: i32) -> i32 {
    %c0_i32 = arith.constant 0 : i32
    %c0_i32_0 = arith.constant 0 : i32
    return %c0_i32 : i32
  }
  func.func @transform_3(%arg0: i32) -> (i32, i32, i32) {
    %c0_i32 = arith.constant 0 : i32
    %c0_i32_0 = arith.constant 0 : i32
    %c0_i32_1 = arith.constant 0 : i32
    return %c0_i32, %arg0, %c0_i32_0 : i32, i32, i32
  }
  func.func @transform_4(%arg0: i32) -> (i32, i32) {
    %c0_i32 = arith.constant 0 : i32
    %c0_i32_0 = arith.constant 0 : i32
    return %arg0, %c0_i32 : i32, i32
  }
}

</mosaic_0001>

<bundles_post_ra>
// kernel: tpu_custom_call.1
= control target key start
LH: loop header
LB: loop body
LE: loop exit
PB: predicated region body
PF: predicated region fallthrough
CT: control target
= control target key end

     0   :  { %9 = vsyncpa [#allocation5], 0  ;;  %s335_s0 = inlined_call_operand.hbm [shape: f32[6], index: 0, kind: input, shape index: {}]   ;;  %s336_s1 = inlined_call_operand.vmem [shape: f32[9], index: 1, kind: input, shape index: {}]   ;;  %s337_s2 = inlined_call_operand.vmem [shape: f32[3], index: 2, kind: input, shape index: {}]   ;;  %s338_s3 = inlined_call_operand.hbm [shape: f32[2,8,128], index: 3, kind: input, shape index: {}]   ;;  %s339_s4 = inlined_call_operand.hbm [shape: f32[8,128], index: 4, kind: output, shape index: {}]  }
   0x1   :  { %10 = vsyncpa [#allocation6], 0 }
   0x2   :  { %11 = vsyncpa [#allocation9], 0 }
   0x3   :  { %12 = vsyncpa [#allocation3], 0 }
   0x4   :  { %13 = vsyncpa [#allocation4], 0  ;;  %s28_s17 = sshll.u32 %s336_s1, 4  ;;  %s288_s18 = smov [#allocation2]   ;;  %s29_s17 = int_to_ptr.vmem [resolvable:$true] %s28_s17 }
   0x5   :  { %21 = dma.hbm_to_smem %s335_s0, 16, %s288_s18, [#allocation5]  }
   0x6   :  { %s214_s21 = scalar_lea.vmem %s29_s17, 16  ;;  %p219_p1 = scmp.lt.s32.totalorder %s29_s17, %s29_s17 }
   0x7   :  { %p215_p0 = scmp.ne.s32.totalorder %s29_s17, %s214_s21  ;;  %p220_p2 = scmp.lt.s32.totalorder %s214_s21, %s214_s21 }
   0x9   :  { %p221_p3 = por %p220_p2, %p219_p1 }
   0xb   :  { %p222_p4 = pnand %p221_p3, %p215_p0 }
   0xd   :  { %225 = shalt.err (!%p222_p4)
}
   0xe   :  { %s289_s22 = smov [#allocation7]   ;;  %s38_s25 = sshll.u32 %s337_s2, 4  ;;  %s39_s25 = int_to_ptr.vmem [resolvable:$true] %s38_s25 }
   0xf   :  { %31 = dma.vmem_to_smem %s29_s17, 16, %s289_s22, [#allocation6]  }
  0x10   :  { %s226_s1 = scalar_lea.vmem %s39_s25, 16  ;;  %p231_p6 = scmp.lt.s32.totalorder %s39_s25, %s39_s25 }
  0x11   :  { %p227_p5 = scmp.ne.s32.totalorder %s39_s25, %s226_s1  ;;  %p232_p7 = scmp.lt.s32.totalorder %s226_s1, %s226_s1 }
  0x13   :  { %p233_p8 = por %p232_p7, %p231_p6 }
  0x15   :  { %p234_p9 = pnand %p233_p8, %p227_p5 }
  0x17   :  { %237 = shalt.err (!%p234_p9)
}
  0x18   :  { %s290_s0 = smov [#allocation8]   ;;  %s291_s26 = smov [#allocation10]  }
  0x19   :  { %41 = dma.vmem_to_smem %s39_s25, 16, %s290_s0, [#allocation9]  }
  0x1a   :  { %s47_s27 = sshll.u32 %s291_s26, 4  ;;  %s48_s27 = int_to_ptr.vmem [resolvable:$true] %s47_s27 }
  0x1b   :  { %s246_s28 = scalar_lea.vmem %s48_s27, 256  ;;  %p251_p11 = scmp.lt.s32.totalorder %s48_s27, %s48_s27 }
  0x1c   :  { %p247_p10 = scmp.ne.s32.totalorder %s48_s27, %s246_s28  ;;  %p252_p12 = scmp.lt.s32.totalorder %s246_s28, %s246_s28 }
  0x1e   :  { %p253_p13 = por %p252_p12, %p251_p11 }
  0x20   :  { %p254_p0 = pnand %p253_p13, %p247_p10 }
  0x22   :  { %257 = shalt.err (!%p254_p0)
}
  0x23   :  { %s292_s2 = smov 128   ;;  %s293_s29 = smov 8  }
  0x24   :  { %53 = dma.hbm_to_vmem [thread:$0]  %s338_s3, 256, %s48_s27, [#allocation3], %s292_s2, %s292_s2, %s293_s29  }
  0x25   :  { %278 = dma.done.wait [#allocation5], 16  }
  0x26   :  { %279 = vsyncadd [#allocation5], 4294967280 }
  0x27   :  { %280 = dma.done.wait [#allocation6], 16  }
  0x28   :  { %281 = vsyncadd [#allocation6], 4294967280 }
  0x29   :  { %282 = dma.done.wait [#allocation9], 16  }
  0x2a   :  { %283 = vsyncadd [#allocation9], 4294967280 }
  0x2b   :  { %284 = dma.done.wait [#allocation3], 256  }
  0x2c   :  { %285 = vsyncadd [#allocation3], 4294967040 }
  0x2d   :  { %66 = sfence }
  0x2e   :  { %s67_s6 = sld [smem:[#allocation2]]  ;;  %v85_v0 = vld [vmem:[#allocation10] sm:$0xff]  ;;  %v88_v1 = vld [vmem:[#allocation10 + $0x8] sm:$0xff]  ;;  %s294_s23 = smov [#allocation11]  }
  0x2f   :  { %s176_s7 = sld [smem:[#allocation2 + $0x1]]  ;;  %s163_s24 = sshll.u32 %s294_s23, 4  ;;  %s164_s24 = int_to_ptr.vmem [resolvable:$true] %s163_s24 }
  0x30   :  { %s177_s8 = sld [smem:[#allocation2 + $0x2]]  ;;  %s258_s25 = scalar_lea.vmem %s164_s24, 128 }
  0x31   :  { %s178_s9 = sld [smem:[#allocation2 + $0x3]]  ;;  %p259_p1 = scmp.ne.s32.totalorder %s164_s24, %s258_s25 }
  0x32   :  { %s179_s10 = sld [smem:[#allocation2 + $0x4]]  ;;  %p263_p2 = scmp.lt.s32.totalorder %s164_s24, %s164_s24 }
  0x33   :  { %s180_s11 = sld [smem:[#allocation2 + $0x5]]  ;;  %p264_p3 = scmp.lt.s32.totalorder %s258_s25, %s258_s25 }
  0x34   :  { %s73_s12 = sld [smem:[#allocation7]]  ;;  %v89_v2 = vstv %s67_s6 }
  0x35   :  { %s181_s3 = sld [smem:[#allocation7 + $0x1]]  ;;  %v90_v3 = vsub.f32 %v85_v0, %v89_v2  ;;  %v91_v4 = vstv %s176_s7  ;;  %p265_p4 = por %p264_p3, %p263_p2 }
  0x36   :  { %s182_s13 = sld [smem:[#allocation7 + $0x2]]  ;;  %v92_v5 = vsub.f32 %v88_v1, %v91_v4  ;;  %v106_v6 = vstv %s177_s8 }
  0x37   :  { %s183_s14 = sld [smem:[#allocation7 + $0x3]]  ;;  %v93_v7 = vmul.f32 %v90_v3, %v90_v3  ;;  %v107_v8 = vsub.f32 %v85_v0, %v106_v6  ;;  %v108_v9 = vstv %s178_s9  ;;  %p266_p5 = pnand %p265_p4, %p259_p1 }
  0x38   :  { %s184_s15 = sld [smem:[#allocation7 + $0x4]]  ;;  %v96_v10 = vmul.f32 %v92_v5, %v90_v3  ;;  %v109_v11 = vsub.f32 %v88_v1, %v108_v9  ;;  %v123_v12 = vstv %s179_s10  ;;  %v100_v13 = vmul.f32 %v92_v5, %v92_v5 }
  0x39   :  { %s185_s16 = sld [smem:[#allocation7 + $0x5]]  ;;  %v124_v14 = vsub.f32 %v85_v0, %v123_v12  ;;  %v125_v15 = vstv %s180_s11  ;;  %v110_v17 = vmul.f32 %v107_v8, %v107_v8 }
  0x3a   :  { %s186_s17 = sld [smem:[#allocation7 + $0x6]]  ;;  %v94_v16 = vstv %s73_s12  ;;  %v126_v18 = vsub.f32 %v88_v1, %v125_v15  ;;  %v113_v21 = vmul.f32 %v109_v11, %v107_v8  ;;  %v117_v24 = vmul.f32 %v109_v11, %v109_v11 }
  0x3b   :  { %s187_s18 = sld [smem:[#allocation7 + $0x7]]  ;;  %v95_v19 = vmul.f32 %v94_v16, %v93_v7  ;;  %v97_v20 = vstv %s181_s3  ;;  %v127_v27 = vmul.f32 %v124_v14, %v124_v14 }
  0x3c   :  { %s188_s19 = sld [smem:[#allocation7 + $0x8]]  ;;  %v98_v22 = vmul.f32 %v97_v20, %v96_v10  ;;  %v101_v23 = vstv %s182_s13  ;;  %v130_v31 = vmul.f32 %v126_v18, %v124_v14  ;;  %v134_v34 = vmul.f32 %v126_v18, %v126_v18 }
  0x3d   :  { %s82_s20 = sld [smem:[#allocation8]]  ;;  %v102_v25 = vmul.f32 %v101_v23, %v100_v13  ;;  %v111_v26 = vstv %s183_s14 }
  0x3e   :  { %s189_s21 = sld [smem:[#allocation8 + $0x1]]  ;;  %v99_v28 = vadd.f32 %v98_v22, %v95_v19  ;;  %v112_v29 = vmul.f32 %v111_v26, %v110_v17  ;;  %v114_v30 = vstv %s184_s15 }
  0x3f   :  { %s190_s22 = sld [smem:[#allocation8 + $0x2]]  ;;  %v115_v32 = vmul.f32 %v114_v30, %v113_v21  ;;  %v118_v33 = vstv %s185_s16 }
  0x40   :  { %v103_v35 = vadd.f32 %v102_v25, %v99_v28  ;;  %v119_v36 = vmul.f32 %v118_v33, %v117_v24  ;;  %v128_v37 = vstv %s186_s17 }
  0x41   :  { %v116_v38 = vadd.f32 %v115_v32, %v112_v29  ;;  %v129_v39 = vmul.f32 %v128_v37, %v127_v27  ;;  %v131_v40 = vstv %s187_s18 }
  0x42   :  { %v132_v41 = vmul.f32 %v131_v40, %v130_v31  ;;  %v135_v42 = vstv %s188_s19 }
  0x43   :  { %v104_v43 = vstv %s82_s20  ;;  %v120_v44 = vadd.f32 %v119_v36, %v116_v38  ;;  %v136_v45 = vmul.f32 %v135_v42, %v134_v34 }
  0x44   :  { %v105_v46 = vadd.f32 %v104_v43, %v103_v35  ;;  %v121_v47 = vstv %s189_s21  ;;  %v133_v48 = vadd.f32 %v132_v41, %v129_v39 }
  0x45   :  { %v122_v49 = vadd.f32 %v121_v47, %v120_v44  ;;  %v138_v50 = vstv %s190_s22 }
  0x46   :  { %v137_v51 = vadd.f32 %v136_v45, %v133_v48 }
  0x47   :  { %v140_v52 = vmax.f32 %v105_v46, %v122_v49 }
  0x48   :  { %v139_v53 = vadd.f32 %v138_v50, %v137_v51 }
  0x4a   :  { %v141_v54 = vmax.f32 %v140_v52, %v139_v53 }
  0x4c   :  { %v142_v55 = vsub.f32 %v105_v46, %v141_v54  ;;  %v145_v56 = vsub.f32 %v122_v49, %v141_v54  ;;  %v149_v57 = vsub.f32 %v139_v53, %v141_v54 }
  0x4e   :  { %v143_v58 = vmul.f32 1.442695, %v142_v55  ;;  %v146_v59 = vmul.f32 1.442695, %v145_v56  ;;  %v150_v60 = vmul.f32 1.442695, %v149_v57 }
  0x50   :  { %198 = vpow2.f32 %v143_v58 }
  0x51   :  { %200 = vpow2.f32 %v146_v59 }
  0x52   :  { %202 = vpow2.f32 %v150_v60 }
  0x5d   :  { %v199_v61 = vpop.eup %198 }
  0x5e   :  { %v201_v62 = vpop.eup %200 }
  0x5f   :  { %v203_v63 = vpop.eup %202  ;;  %v148_v0 = vadd.f32 %v201_v62, %v199_v61 }
  0x61   :  { %v152_v1 = vadd.f32 %v203_v63, %v148_v0 }
  0x63   :  { %204 = vlog2.f32 %v152_v1 }
  0x70   :  { %v205_v2 = vpop.eup %204 }
  0x71   :  { %v154_v3 = vmul.f32 0.6931472, %v205_v2 }
  0x73   :  { %v155_v4 = vadd.f32 %v154_v3, %v141_v54 }
  0x75   :  { %156 = vst [vmem:[#allocation11] sm:$0xff] %v155_v4 }
  0x76   :  { %269 = shalt.err (!%p266_p5)
}
  0x77   :  { %166 = dma.vmem_to_hbm [thread:$0]  %s164_s24, 128, %s339_s4, [#allocation4]  }
  0x78   :  { %286 = dma.done.wait [#allocation4], 128  }
  0x79   :  { %287 = vsyncadd [#allocation4], 4294967168 }
  0x7a   :  { %170 = vsyncpa [#allocation3], 1 }
  0x7b   :  { %171 = vsyncpa [#allocation4], 1 }
  0x7c   :  { %172 = vsyncpa [#allocation5], 1 }
  0x7d   :  { %173 = vsyncpa [#allocation6], 1 }
  0x7e   :  { %174 = vsyncpa [#allocation9], 1 }

</bundles_post_ra>
